<compile_context>
chip_gen: v6e
topology: v6e:2x2x1
jax: 0.10.0
libtpu: 0.0.40
codegen_flags: <defaults>
</compile_context>

<pallas_src>
import jax
import jax.numpy as jnp
from jax.experimental import pallas as pl
from jax.experimental.pallas import tpu as pltpu


def _round_up(n, m):
    return ((n + m - 1) // m) * m


def _baseline_mean_kernel(past_y_ref, mean_ref):
    # past_y_ref: (TB, S_past, Dy) VMEM tile; reduce over the time (sublane) axis.
    py = past_y_ref[...].astype(jnp.float32)
    s_past = py.shape[1]
    m = jnp.sum(py, axis=1, keepdims=True) * (1.0 / s_past)   # (TB, 1, Dy)
    mean_ref[...] = m.astype(mean_ref.dtype)


def baseline_mean_forward(std_param, past_x, past_y, future_x, future_y=None):
    """Returns ((mean, std), {}) mirroring (Normal(mean, std), {})."""
    B, S_past, Dy = past_y.shape
    _, S_fut, _ = future_x.shape

    # ---- choose batch tile TB from the *padded* VMEM footprint ----
    pad_dy = _round_up(Dy, 128)          # lane padding
    pad_sp = _round_up(S_past, 8)        # sublane padding
    in_row_bytes = pad_sp * pad_dy * past_y.dtype.itemsize
    out_row_bytes = 8 * pad_dy * past_y.dtype.itemsize  # (TB,1,Dy) tile, sublane-padded
    row_bytes = in_row_bytes + out_row_bytes
    # Per-buffer budget; double-buffered this stays well under v7x's 64 MiB VMEM
    # and under the raised scoped limit below on v5e/v6e.
    budget_bytes = 12 << 20
    tb = max(1, min(B, budget_bytes // max(row_bytes, 1)))
    grid = (pl.cdiv(B, tb),)

    mean_b1d = pl.pallas_call(
        _baseline_mean_kernel,
        out_shape=jax.ShapeDtypeStruct((B, 1, Dy), past_y.dtype),
        grid=grid,
        in_specs=[
            # full S_past x Dy window for TB batch rows per grid step
            pl.BlockSpec((tb, S_past, Dy), lambda b: (b, 0, 0)),
        ],
        out_specs=pl.BlockSpec((tb, 1, Dy), lambda b: (b, 0, 0)),
        compiler_params=pltpu.CompilerParams(
            dimension_semantics=("parallel",),   # safe: each step owns its output block
            vmem_limit_bytes=48 << 20,
        ),
    )(past_y)

    # Broadcasts done in the wrapper (fused by XLA; avoids redundant HBM writes).
    mean = jnp.broadcast_to(mean_b1d, (B, S_fut, Dy))
    std_scalar = jnp.asarray(std_param).reshape(()) * 1.0
    std = jnp.broadcast_to(std_scalar, (1, S_fut, 1)).astype(std_scalar.dtype)

    # TODO(synk): torch.distributions.Normal has no Pallas/JAX-array equivalent
    # here; we return its (mean, std) parameters instead.
    return (mean, std), {}


if __name__ == "__main__":
    key = jax.random.PRNGKey(0)
    k1, k2, k3 = jax.random.split(key, 3)

    B, S_past, S_fut, Fx, Dy = 2, 16, 8, 6, 4
    past_x = jax.random.normal(k1, (B, S_past, Fx), jnp.float32)
    past_y = jax.random.normal(k2, (B, S_past, Dy), jnp.float32)
    future_x = jax.random.normal(k3, (B, S_fut, Fx), jnp.float32)

    # nn.Parameter(torch.tensor(1.0))
    std_param = jnp.array(1.0, dtype=jnp.float32)

    (mean, std), extras = baseline_mean_forward(std_param, past_x, past_y, future_x)
    jax.block_until_ready((mean, std))

    # reference check
    ref_mean = jnp.broadcast_to(past_y.mean(axis=1, keepdims=True), (B, S_fut, Dy))
    ref_std = jnp.full((1, S_fut, 1), 1.0, dtype=jnp.float32)
    assert mean.shape == (B, S_fut, Dy) and std.shape == (1, S_fut, 1)
    assert jnp.allclose(mean, ref_mean, atol=1e-5, rtol=1e-5)
    assert jnp.allclose(std, ref_std)
    assert extras == {}

    print("KERNEL_OK")
</pallas_src>

<mosaic_0001>
module attributes {stable_mosaic.version = 11 : i64} {
  func.func @_baseline_mean_kernel(%arg0: i32, %arg1: memref<2x16x4xf32, #tpu.memory_space<vmem>>, %arg2: memref<2x1x4xf32, #tpu.memory_space<vmem>>) attributes {dimension_semantics = [#tpu.dimension_semantics<parallel>], iteration_bounds = array<i64: 1>, scalar_prefetch = 0 : i64, scratch_operands = 0 : i64, tpu.core_type = #tpu.core_type<tc>, window_params = [{transform_indices = @transform_0, window_bounds = array<i64: 2, 16, 4>}, {transform_indices = @transform_1, window_bounds = array<i64: 2, 1, 4>}]} {
    %c0 = arith.constant 0 : index
    %c0_0 = arith.constant 0 : index
    %c0_1 = arith.constant 0 : index
    %0 = vector.load %arg1[%c0, %c0_0, %c0_1] : memref<2x16x4xf32, #tpu.memory_space<vmem>>, vector<2x16x4xf32>
    %cst = arith.constant dense<0.000000e+00> : vector<2x4xf32>
    %1 = vector.multi_reduction <add>, %0, %cst [1] : vector<2x16x4xf32> to vector<2x4xf32>
    %2 = vector.shape_cast %1 : vector<2x4xf32> to vector<2x1x4xf32>
    %cst_2 = arith.constant 6.250000e-02 : f32
    %3 = vector.broadcast %cst_2 : f32 to vector<2x1x4xf32>
    %4 = arith.mulf %2, %3 : vector<2x1x4xf32>
    %c0_3 = arith.constant 0 : index
    %c0_4 = arith.constant 0 : index
    %c0_5 = arith.constant 0 : index
    %5 = vector.load %arg2[%c0_3, %c0_4, %c0_5] : memref<2x1x4xf32, #tpu.memory_space<vmem>>, vector<2x1x4xf32>
    tpu.vector_store %arg2[%c0_3, %c0_4, %c0_5], %4 {strides = array<i32>} : memref<2x1x4xf32, #tpu.memory_space<vmem>>, vector<2x1x4xf32>,
    return
  }
  func.func @transform_0(%arg0: i32) -> (i32, i32, i32) {
    %c0_i32 = arith.constant 0 : i32
    %c0_i32_0 = arith.constant 0 : i32
    %c0_i32_1 = arith.constant 0 : i32
    return %arg0, %c0_i32, %c0_i32_0 : i32, i32, i32
  }
  func.func @transform_1(%arg0: i32) -> (i32, i32, i32) {
    %c0_i32 = arith.constant 0 : i32
    %c0_i32_0 = arith.constant 0 : i32
    %c0_i32_1 = arith.constant 0 : i32
    return %arg0, %c0_i32, %c0_i32_0 : i32, i32, i32
  }
}

</mosaic_0001>

<bundles_post_ra>
// kernel: tpu_custom_call.1
= control target key start
LH: loop header
LB: loop body
LE: loop exit
PB: predicated region body
PF: predicated region fallthrough
CT: control target
= control target key end

     0   :  { %vm13_vm0 = vcmask 31744   ;;  %s106_s0 = inlined_call_operand.vmem [shape: f32[2,16,4], index: 0, kind: input, shape index: {}]   ;;  %s107_s1 = inlined_call_operand.hbm [shape: f32[2,1,4], index: 1, kind: output, shape index: {}]  }
   0x1   :  { %v9_v0 = vld [vmem:[%s106_s0] sm:$0xff]  ;;  %v10_v1 = vld [vmem:[%s106_s0 + $0x8] sm:$0xff]  ;;  %v11_v2 = vld [vmem:[%s106_s0 + $0x10] sm:$0xff] }
   0x2   :  { %v14_v3 = vsel %vm13_vm0, %v9_v0, 0.0  ;;  %v15_v4 = vsel %vm13_vm0, %v10_v1, 0.0  ;;  %v12_v5 = vld [vmem:[%s106_s0 + $0x18] sm:$0xff]  ;;  %v23_v6 = vsel %vm13_vm0, %v11_v2, 0.0 }
   0x3   :  { %6 = vsyncpa [#allocation3], 0  ;;  %v16_v7 = vadd.f32 %v15_v4, %v14_v3  ;;  %v24_v8 = vsel %vm13_vm0, %v12_v5, 0.0  ;;  %s78_s14 = smov [#allocation2]   ;;  %vm34_vm1 = vcmask 24576  }
   0x4   :  { %v25_v9 = vadd.f32 %v24_v8, %v23_v6  ;;  %s42_s15 = sshll.u32 %s78_s14, 4  ;;  %s43_s15 = int_to_ptr.vmem [resolvable:$true] %s42_s15 }
   0x5   :  { %v17_v10 = vrot.slane %v16_v7, 4  ;;  %s56_s0 = scalar_lea.vmem %s43_s15, 32  ;;  %p61_p1 = scmp.lt.s32.totalorder %s43_s15, %s43_s15 }
   0x6   :  { %v26_v11 = vrot.slane %v25_v9, 4  ;;  %p57_p0 = scmp.ne.s32.totalorder %s43_s15, %s56_s0  ;;  %p62_p2 = scmp.lt.s32.totalorder %s56_s0, %s56_s0 }
   0x7   :  { %v18_v12 = vadd.f32 %v17_v10, %v16_v7 }
   0x8   :  { %v27_v13 = vadd.f32 %v26_v11, %v25_v9  ;;  %p63_p3 = por %p62_p2, %p61_p1 }
   0x9   :  { %v19_v14 = vrot.slane %v18_v12, 2 }
   0xa   :  { %v28_v15 = vrot.slane %v27_v13, 2  ;;  %p64_p4 = pnand %p63_p3, %p57_p0 }
   0xb   :  { %v20_v16 = vadd.f32 %v19_v14, %v18_v12 }
   0xc   :  { %v29_v17 = vadd.f32 %v28_v15, %v27_v13 }
   0xd   :  { %v21_v18 = vrot.slane %v20_v16, 1 }
   0xe   :  { %v30_v19 = vrot.slane %v29_v17, 1 }
   0xf   :  { %v22_v20 = vadd.f32 %v21_v18, %v20_v16 }
  0x10   :  { %v31_v21 = vadd.f32 %v30_v19, %v29_v17 }
  0x11   :  { %v32_v22 = vmul.f32 0.0625, %v22_v20 }
  0x12   :  { %v33_v23 = vmul.f32 0.0625, %v31_v21 }
  0x13   :  { %35 = vst.msk [vmem:[#allocation2] sm:$0x1] %vm34_vm1, %v32_v22 }
  0x14   :  { %36 = vst.msk [vmem:[#allocation2 + $0x1] sm:$0x1] %vm34_vm1, %v33_v23 }
  0x15   :  { %67 = shalt.err (!%p64_p4)
}
  0x16   :  { %s79_s16 = smov 16   ;;  %s80_s17 = smov 1  }
  0x17   :  { %48 = dma.vmem_to_hbm [thread:$0]  %s43_s15, 32, %s107_s1, [#allocation3], %s79_s16, %s79_s16, %s80_s17  }
  0x18   :  { %76 = dma.done.wait [#allocation3], 32  }
  0x19   :  { %77 = vsyncadd [#allocation3], 4294967264 }
  0x1a   :  { %52 = vsyncpa [#allocation3], 1 }

</bundles_post_ra>
